<compile_context>
chip_gen: v7x
topology: tpu7x:2x2x1
jax: 0.10.0
libtpu: 0.0.40
codegen_flags: <defaults>
</compile_context>

<pallas_src>
import jax
import jax.numpy as jnp
from jax.experimental import pallas as pl
from jax.experimental.pallas import tpu as pltpu


def _concat_linear_kernel(xy_ref, w_ref, b_ref, o_ref):
    # xy_ref: [B, 2N] (resident, compute dtype)
    # w_ref : [1, 2N, tile_n] (contiguous weight tile, streamed)
    # b_ref : [1, 1, tile_n]  (f32 bias tile)
    # o_ref : [B, tile_n]
    acc = jnp.dot(xy_ref[...], w_ref[0], preferred_element_type=jnp.float32)
    o_ref[...] = (acc + b_ref[0]).astype(o_ref.dtype)


def _choose_tile_n(n_pad, two_n, itemsize, *, min_tiles=2,
                   budget_bytes=6 * 1024 * 1024):
    """Largest lane-aligned tile_n dividing n_pad s.t. the weight block stays
    under `budget_bytes` and (when possible) the grid has >= min_tiles steps."""
    m = n_pad // 128
    for k in range(m, 0, -1):
        if m % k:
            continue
        tile_n = 128 * k
        n_tiles = m // k
        if n_tiles < min_tiles and m >= min_tiles:
            continue  # keep >= min_tiles tiles so v7x can shard across both TCs
        if two_n * tile_n * itemsize <= budget_bytes:
            return tile_n
    return 128


def prepare_concat_net_params(w, b, *, weight_dtype=jnp.bfloat16,
                              min_tiles=2, budget_bytes=6 * 1024 * 1024):
    """One-time parameter prep (outside the hot path).

    w: [N, 2N] PyTorch nn.Linear weight layout; b: [N].
    Returns (w_tiles [n_tiles, 2N, tile_n], b_tiles [n_tiles, 1, tile_n], N):
      * transposed so the contraction dim leads,
      * output dim padded to a multiple of 128,
      * cast to `weight_dtype` (bf16 default) to cut streamed HBM bytes,
      * re-laid-out tile-major so each grid step is one contiguous DMA.
    """
    N = int(w.shape[0])
    two_n = int(w.shape[1])
    assert two_n == 2 * N
    n_pad = ((N + 127) // 128) * 128

    w_t = jnp.transpose(w).astype(jnp.float32)        # [2N, N]
    b_p = b.astype(jnp.float32)
    if n_pad != N:
        w_t = jnp.pad(w_t, ((0, 0), (0, n_pad - N)))
        b_p = jnp.pad(b_p, (0, n_pad - N))
    if weight_dtype is not None:
        w_t = w_t.astype(weight_dtype)

    itemsize = jnp.dtype(w_t.dtype).itemsize
    tile_n = _choose_tile_n(n_pad, two_n, itemsize,
                            min_tiles=min_tiles, budget_bytes=budget_bytes)
    n_tiles = n_pad // tile_n

    # Tile-major re-layout: [n_tiles, 2N, tile_n] -> contiguous block per step.
    w_tiles = w_t.reshape(two_n, n_tiles, tile_n).transpose(1, 0, 2)
    b_tiles = b_p.reshape(n_tiles, 1, tile_n)
    return w_tiles, b_tiles, N


def concat_net_forward(x, y, w_tiles, b_tiles, num_classes):
    """x, y: [B, N] f32; w_tiles: [n_tiles, 2N, tile_n]; b_tiles: [n_tiles, 1, tile_n]."""
    B = x.shape[0]
    n_tiles, two_n, tile_n = w_tiles.shape
    n_pad = n_tiles * tile_n
    assert two_n == x.shape[1] + y.shape[1]
    compute_dtype = w_tiles.dtype

    # Tiny one-time ops per call (off the streamed-weight path): concat + cast.
    xy = jnp.concatenate([x, y], axis=1).astype(compute_dtype)

    out = pl.pallas_call(
        _concat_linear_kernel,
        out_shape=jax.ShapeDtypeStruct((B, n_pad), x.dtype),
        grid=(n_tiles,),
        in_specs=[
            pl.BlockSpec((B, two_n), lambda j: (0, 0)),             # xy (resident)
            pl.BlockSpec((1, two_n, tile_n), lambda j: (j, 0, 0)),  # contiguous weight tile
            pl.BlockSpec((1, 1, tile_n), lambda j: (j, 0, 0)),      # f32 bias tile
        ],
        out_specs=pl.BlockSpec((B, tile_n), lambda j: (0, j)),      # lane-dense stores
        compiler_params=pltpu.CompilerParams(
            dimension_semantics=("parallel",),   # shard N-tiles across TCs (v7x)
        ),
    )(xy, w_tiles, b_tiles)

    if num_classes != n_pad:
        out = out[:, :num_classes]
    return out


def _run_case(num_classes, batch, key):
    kx, ky, kw, kb = jax.random.split(key, 4)
    x = jax.random.normal(kx, (batch, num_classes), dtype=jnp.float32)
    y = jax.random.normal(ky, (batch, num_classes), dtype=jnp.float32)

    fan_in = 2 * num_classes
    bound = 1.0 / (fan_in ** 0.5)
    w = jax.random.uniform(kw, (num_classes, 2 * num_classes),
                           minval=-bound, maxval=bound, dtype=jnp.float32)
    b = jax.random.uniform(kb, (num_classes,),
                           minval=-bound, maxval=bound, dtype=jnp.float32)

    # One-time parameter prep (transpose + pad + bf16 + tile-major), off the hot path.
    w_tiles, b_tiles, n = prepare_concat_net_params(w, b, weight_dtype=jnp.bfloat16)

    out = concat_net_forward(x, y, w_tiles, b_tiles, n)
    out = jax.block_until_ready(out)

    # Reference with matching bf16 input rounding and f32 accumulation.
    xy = jnp.concatenate([x, y], axis=1)
    ref = jnp.dot(xy.astype(jnp.bfloat16), jnp.transpose(w).astype(jnp.bfloat16),
                  preferred_element_type=jnp.float32) + b
    assert out.shape == (batch, num_classes)
    assert jnp.allclose(out, ref, atol=1e-2, rtol=1e-2), (
        f"mismatch vs reference for num_classes={num_classes}")


if __name__ == "__main__":
    key = jax.random.PRNGKey(0)
    k1, k2, k3 = jax.random.split(key, 3)

    # Small lane-aligned case (single tile).
    _run_case(num_classes=128, batch=8, key=k1)
    # Non-128-multiple case -> pad-to-lane-dense path, 2 tiles.
    _run_case(num_classes=192, batch=8, key=k2)
    # Multi-tile case (3 tiles) with a larger batch.
    _run_case(num_classes=384, batch=16, key=k3)

    print("KERNEL_OK")
</pallas_src>

<mosaic_0001>
module attributes {stable_mosaic.version = 11 : i64} {
  func.func @_concat_linear_kernel(%arg0: i32, %arg1: memref<8x256xbf16, #tpu.memory_space<vmem>>, %arg2: memref<1x256x128xbf16, #tpu.memory_space<vmem>>, %arg3: memref<1x1x128xf32, #tpu.memory_space<vmem>>, %arg4: memref<8x128xf32, #tpu.memory_space<vmem>>) attributes {dimension_semantics = [#tpu.dimension_semantics<parallel>], iteration_bounds = array<i64: 1>, scalar_prefetch = 0 : i64, scratch_operands = 0 : i64, tpu.core_type = #tpu.core_type<tc>, window_params = [{pipeline_mode = #tpu.pipeline_mode<synchronous>, transform_indices = @transform_0, window_bounds = array<i64: 8, 256>}, {transform_indices = @transform_1, window_bounds = array<i64: 1, 256, 128>}, {transform_indices = @transform_2, window_bounds = array<i64: 1, 1, 128>}, {transform_indices = @transform_3, window_bounds = array<i64: 8, 128>}]} {
    %c0 = arith.constant 0 : index
    %c0_0 = arith.constant 0 : index
    %0 = vector.load %arg1[%c0, %c0_0] : memref<8x256xbf16, #tpu.memory_space<vmem>>, vector<8x256xbf16>
    %c0_1 = arith.constant 0 : index
    %c0_2 = arith.constant 0 : index
    %c0_3 = arith.constant 0 : index
    %1 = vector.load %arg2[%c0_1, %c0_2, %c0_3] : memref<1x256x128xbf16, #tpu.memory_space<vmem>>, vector<1x256x128xbf16>
    %2 = vector.shape_cast %1 : vector<1x256x128xbf16> to vector<256x128xbf16>
    %cst = arith.constant dense<0.000000e+00> : vector<8x128xf32>
    %3 = tpu.matmul %0, %2, %cst {dimension_numbers = #tpu.dot_dimension_numbers<[1], [0], [0], [1], [0, 0, 1, 1], [], []>} : vector<8x256xbf16>, vector<256x128xbf16>, vector<8x128xf32> -> vector<8x128xf32>
    %c0_4 = arith.constant 0 : index
    %c0_5 = arith.constant 0 : index
    %c0_6 = arith.constant 0 : index
    %4 = vector.load %arg3[%c0_4, %c0_5, %c0_6] : memref<1x1x128xf32, #tpu.memory_space<vmem>>, vector<1x1x128xf32>
    %5 = vector.shape_cast %4 : vector<1x1x128xf32> to vector<1x128xf32>
    %6 = vector.broadcast %5 : vector<1x128xf32> to vector<8x128xf32>
    %7 = arith.addf %3, %6 : vector<8x128xf32>
    %c0_7 = arith.constant 0 : index
    %c0_8 = arith.constant 0 : index
    %8 = vector.load %arg4[%c0_7, %c0_8] : memref<8x128xf32, #tpu.memory_space<vmem>>, vector<8x128xf32>
    tpu.vector_store %arg4[%c0_7, %c0_8], %7 {strides = array<i32>} : memref<8x128xf32, #tpu.memory_space<vmem>>, vector<8x128xf32>,
    return
  }
  func.func @transform_0(%arg0: i32) -> (i32, i32) {
    %c0_i32 = arith.constant 0 : i32
    %c0_i32_0 = arith.constant 0 : i32
    %c0_i32_1 = arith.constant 0 : i32
    return %c0_i32, %c0_i32_0 : i32, i32
  }
  func.func @transform_1(%arg0: i32) -> (i32, i32, i32) {
    %c0_i32 = arith.constant 0 : i32
    %c0_i32_0 = arith.constant 0 : i32
    %c0_i32_1 = arith.constant 0 : i32
    return %arg0, %c0_i32, %c0_i32_0 : i32, i32, i32
  }
  func.func @transform_2(%arg0: i32) -> (i32, i32, i32) {
    %c0_i32 = arith.constant 0 : i32
    %c0_i32_0 = arith.constant 0 : i32
    %c0_i32_1 = arith.constant 0 : i32
    return %arg0, %c0_i32, %c0_i32_0 : i32, i32, i32
  }
  func.func @transform_3(%arg0: i32) -> (i32, i32) {
    %c0_i32 = arith.constant 0 : i32
    %c0_i32_0 = arith.constant 0 : i32
    return %c0_i32, %arg0 : i32, i32
  }
}

</mosaic_0001>

<bundles_post_ra>
// kernel: tpu_custom_call.1
= control target key start
LH: loop header
LB: loop body
LE: loop exit
PB: predicated region body
PF: predicated region fallthrough
CT: control target
= control target key end

     0   :  { %8 = vsyncpa [#allocation3], 0  ;;  %s449_s0 = inlined_call_operand.hbm [shape: bf16[8,256], index: 0, kind: input, shape index: {}]   ;;  %s450_s1 = inlined_call_operand.hbm [shape: bf16[1,256,128], index: 1, kind: input, shape index: {}]   ;;  %s451_s2 = inlined_call_operand.vmem [shape: f32[1,1,128], index: 2, kind: input, shape index: {}]   ;;  %s452_s3 = inlined_call_operand.hbm [shape: f32[8,128], index: 3, kind: output, shape index: {}]  }
   0x1   :  { %9 = vsyncpa [#allocation6], 0 }
   0x2   :  { %10 = vsyncpa [#allocation4], 0  ;;  %s378_s12 = smov [#allocation2]   ;;  %s379_s14 = smov [#allocation5]  }
   0x3   :  { %s17_s13 = sshll.u32 %s378_s12, 4  ;;  %s26_s15 = sshll.u32 %s379_s14, 4  ;;  %s18_s13 = int_to_ptr.vmem [resolvable:$true] %s17_s13  ;;  %s403_s15 = int_to_ptr.vmem [resolvable:$true] %s26_s15 }
   0x4   :  { %s306_s18 = scalar_lea.hbm %s449_s0, 128 }
   0x5   :  { %p307_p0 = scmp.ne.s32.totalorder %s449_s0, %s306_s18  ;;  %p310_p1 = scmp.lt.u32.totalorder %s306_s18, %s449_s0 }
   0x7   :  { %p312_p2 = pnand %p310_p1, %p307_p0 }
   0x9   :  { %315 = shalt.err (!%p312_p2)
}
   0xa   :  { %s316_s23 = scalar_lea.vmem %s18_s13, 128  ;;  %p321_p4 = scmp.lt.s32.totalorder %s18_s13, %s18_s13 }
   0xb   :  { %p317_p3 = scmp.ne.s32.totalorder %s18_s13, %s316_s23  ;;  %p322_p5 = scmp.lt.s32.totalorder %s316_s23, %s316_s23 }
   0xd   :  { %p323_p6 = por %p322_p5, %p321_p4 }
   0xf   :  { %p324_p7 = pnand %p323_p6, %p317_p3 }
  0x11   :  { %327 = shalt.err (!%p324_p7)
}
  0x12   :  { %20 = dma.hbm_to_vmem [thread:$0]  %s449_s0, 128, %s18_s13, [#allocation3]  }
  0x13   :  { %s328_s28 = scalar_lea.hbm %s450_s1, 2048 }
  0x14   :  { %p329_p8 = scmp.ne.s32.totalorder %s450_s1, %s328_s28  ;;  %p332_p9 = scmp.lt.u32.totalorder %s328_s28, %s450_s1 }
  0x16   :  { %p334_p10 = pnand %p332_p9, %p329_p8 }
  0x18   :  { %337 = shalt.err (!%p334_p10)
}
  0x19   :  { %s338_s6 = scalar_lea.vmem %s403_s15, 2048  ;;  %p343_p12 = scmp.lt.s32.totalorder %s403_s15, %s403_s15 }
  0x1a   :  { %p339_p11 = scmp.ne.s32.totalorder %s403_s15, %s338_s6  ;;  %p344_p13 = scmp.lt.s32.totalorder %s338_s6, %s338_s6 }
  0x1c   :  { %p345_p0 = por %p344_p13, %p343_p12 }
  0x1e   :  { %p346_p1 = pnand %p345_p0, %p339_p11 }
  0x20   :  { %349 = shalt.err (!%p346_p1)
}
  0x21   :  { %s380_s0 = smov 64   ;;  %s381_s7 = smov 4  }
  0x22   :  { %32 = dma.hbm_to_vmem [thread:$0]  %s450_s1, 2048, %s403_s15, [#allocation6], %s380_s0, %s380_s0, %s381_s7  }
  0x23   :  { %372 = dma.done.wait [#allocation3], 128  }
  0x24   :  { %373 = vsyncadd [#allocation3], 4294967168 }
  0x25   :  { %374 = dma.done.wait [#allocation6], 2048  }
  0x26   :  { %375 = vsyncadd [#allocation6], 4294965248  ;;  %v288_v0 = vld [vmem:[#allocation5 + $0x40] sm:$0xff]   ;;  %v290_v2 = vld [vmem:[#allocation5 + $0x48] sm:$0xff]   ;;  %s382_s11 = smov [#allocation7]  }
  0x27   :  { %v289_v1 = vld [vmem:[#allocation5] sm:$0xff]   ;;  %261 = vmatprep.subr.bf16.mxu0 %v288_v0  ;;  %v291_v3 = vld [vmem:[#allocation5 + $0x8] sm:$0xff]   ;;  %v292_v4 = vld [vmem:[#allocation5 + $0x50] sm:$0xff]   ;;  %s232_s12 = sshll.u32 %s382_s11, 4  ;;  %s233_s12 = int_to_ptr.vmem [resolvable:$true] %s232_s12 }
  0x28   :  { %262 = vmatpush3.bf16.msra.mxu0 %v289_v1  ;;  %v293_v5 = vld [vmem:[#allocation5 + $0x10] sm:$0xff]   ;;  %v294_v6 = vld [vmem:[#allocation5 + $0x58] sm:$0xff]   ;;  %v296_v8 = vld [vmem:[#allocation5 + $0x60] sm:$0xff]   ;;  %s350_s13 = scalar_lea.vmem %s233_s12, 128  ;;  %p355_p3 = scmp.lt.s32.totalorder %s233_s12, %s233_s12 }
  0x29   :  { %263 = vmatprep.subr.bf16.mxu0 %v290_v2  ;;  %v295_v7 = vld [vmem:[#allocation5 + $0x18] sm:$0xff]   ;;  %v297_v9 = vld [vmem:[#allocation5 + $0x20] sm:$0xff]   ;;  %v298_v10 = vld [vmem:[#allocation5 + $0x68] sm:$0xff]   ;;  %p351_p2 = scmp.ne.s32.totalorder %s233_s12, %s350_s13  ;;  %p356_p4 = scmp.lt.s32.totalorder %s350_s13, %s350_s13 }
  0x2a   :  { %v42_v11 = vld [vmem:[#allocation2] sm:$0xff]  ;;  %v299_v13 = vld [vmem:[#allocation5 + $0x28] sm:$0xff]   ;;  %v300_v14 = vld [vmem:[#allocation5 + $0x70] sm:$0xff]  }
  0x2b   :  { %v244_v12 = vcombine.high %v42_v11, %v42_v11  ;;  %v301_v15 = vld [vmem:[#allocation5 + $0x30] sm:$0xff]   ;;  %v302_v16 = vld [vmem:[#allocation5 + $0x78] sm:$0xff]   ;;  %v243_v18 = vcombine.low %v42_v11, %v42_v11  ;;  %p357_p5 = por %p356_p4, %p355_p3 }
  0x2c   :  { %264 = vmatpush3.bf16.msra.mxu0 %v291_v3  ;;  %v303_v17 = vld [vmem:[#allocation5 + $0x38] sm:$0xff]  }
  0x2d   :  { %265 = vmatprep.subr.bf16.mxu0 %v292_v4  ;;  %217 = vmatprep.mubr.bf16.mxu0 %v244_v12  ;;  %v242_v20 = vld [vmem:[%s451_s2] ss:$0 sm:$0xff]  ;;  %p358_p6 = pnand %p357_p5, %p351_p2 }
  0x30   :  { %266 = vmatpush3.bf16.msra.mxu0 %v293_v5 }
  0x31   :  { %267 = vmatprep.subr.bf16.mxu0 %v294_v6 }
  0x34   :  { %268 = vmatpush3.bf16.msra.mxu0 %v295_v7 }
  0x35   :  { %269 = vmatprep.subr.bf16.mxu0 %v296_v8 }
  0x38   :  { %270 = vmatpush3.bf16.msra.mxu0 %v297_v9 }
  0x39   :  { %271 = vmatprep.subr.bf16.mxu0 %v298_v10 }
  0x3c   :  { %272 = vmatpush3.bf16.msra.mxu0 %v299_v13 }
  0x3d   :  { %273 = vmatprep.subr.bf16.mxu0 %v300_v14 }
  0x40   :  { %274 = vmatpush3.bf16.msra.mxu0 %v301_v15 }
  0x41   :  { %275 = vmatprep.subr.bf16.mxu0 %v302_v16 }
  0x44   :  { %276 = vmatpush3.bf16.msra.mxu0 %v303_v17 }
  0x47   :  { %218 = vmatmul.mubr.bf16.vlgmr.msra.gmra.mrb[0].mxu0 %v243_v18 }
 0x11a   :  { %v277_v19 = vpop.f32.mrb[0].mxu0 }
 0x11b   :  { %v278_v21 = vpop.f32.mrb[1].mxu0 }
 0x11c   :  { %v279_v22 = vadd.f32 %v278_v21, %v277_v19  ;;  %v280_v23 = vpop.f32.mrb[2].mxu0 }
 0x11d   :  { %v281_v24 = vpop.f32.mrb[3].mxu0 }
 0x11e   :  { %v220_v25 = vadd.f32 %v279_v22, %v242_v20 }
 0x120   :  { %225 = vst [vmem:[#allocation7] sm:$0xff] %v220_v25 }
 0x121   :  { %361 = shalt.err (!%p358_p6)
}
 0x122   :  { %s362_s2 = scalar_lea.hbm %s452_s3, 128 }
 0x123   :  { %p363_p7 = scmp.ne.s32.totalorder %s452_s3, %s362_s2  ;;  %p366_p8 = scmp.lt.u32.totalorder %s362_s2, %s452_s3 }
 0x125   :  { %p368_p9 = pnand %p366_p8, %p363_p7 }
 0x127   :  { %371 = shalt.err (!%p368_p9)
}
 0x128   :  { %235 = dma.vmem_to_hbm [thread:$0]  %s233_s12, 128, %s452_s3, [#allocation4]  }
 0x129   :  { %376 = dma.done.wait [#allocation4], 128  }
 0x12a   :  { %377 = vsyncadd [#allocation4], 4294967168 }
 0x12b   :  { %239 = vsyncpa [#allocation3], 1 }
 0x12c   :  { %240 = vsyncpa [#allocation6], 1 }
 0x12d   :  { %241 = vsyncpa [#allocation4], 1 }

</bundles_post_ra>
